<compile_context>
chip_gen: v5e
topology: v5e:2x2
jax: 0.10.0
libtpu: 0.0.40
codegen_flags: <defaults>
</compile_context>

<pallas_src>
import functools

import jax
import jax.numpy as jnp
from jax import lax
from jax.experimental import pallas as pl
from jax.experimental.pallas import tpu as pltpu

LANE = 128
TM_MAX = 256      # dst-row tile ("parallel" grid axis)
TK_MAX = 512      # src/reduction tile ("arbitrary", last grid axis)
TE_MAX = 512      # edge tile for the decoder
VMEM_LIMIT = 32 * 1024 * 1024


def _round_up(x, m):
    return ((x + m - 1) // m) * m


def _pad2(x, rows, cols):
    r, c = x.shape
    if r == rows and c == cols:
        return x
    return jnp.pad(x, ((0, rows - r), (0, cols - c)))


# ---------------------------------------------------------------------------
# SAGEConv layer kernel: tiled mean aggregation + fused weight matmul + bias [+ReLU]
# ---------------------------------------------------------------------------
def _sage_layer_kernel(a_ref, hsrc_ref, hdst_ref, w_ref, b_ref, o_ref, acc_ref, *,
                       apply_relu):
    k = pl.program_id(1)

    @pl.when(k == 0)
    def _init():
        acc_ref[...] = jnp.zeros_like(acc_ref)

    # mean-neighbor aggregation over the (tiled) reduction axis; fp32 accumulate.
    acc_ref[...] += jnp.dot(a_ref[...], hsrc_ref[...],
                            preferred_element_type=jnp.float32)

    @pl.when(k == pl.num_programs(1) - 1)
    def _finalize():
        h_self = hdst_ref[...].astype(jnp.float32)                 # (tm, dp_in)
        # fused self+neighbor weight matmul: K = 2*dp_in fills the MXU pipeline
        cat = jnp.concatenate([h_self, acc_ref[...]], axis=1)      # (tm, 2*dp_in)
        out = jnp.dot(cat, w_ref[...],
                      preferred_element_type=jnp.float32) + b_ref[...]
        if apply_relu:
            out = jnp.maximum(out, 0.0)
        o_ref[...] = out.astype(o_ref.dtype)


def sage_layer(adj, h_src, h_dst, w_self, w_neigh, bias, *, apply_relu):
    """adj: (n_dst, n_src) row-normalized adjacency (mean agg), any float dtype.
    h_src: (n_src, d_in); h_dst: (n_dst, d_in) (first n_dst rows of h_src).
    Returns (n_dst, d_out) fp32."""
    n_dst, n_src = adj.shape
    d_in = h_src.shape[1]
    d_out = w_self.shape[1]

    dp_in = _round_up(d_in, LANE)
    dp_out = _round_up(d_out, LANE)
    tm = min(TM_MAX, _round_up(n_dst, LANE))
    tk = min(TK_MAX, _round_up(n_src, LANE))
    n_dst_p = _round_up(n_dst, tm)
    n_src_p = _round_up(n_src, tk)

    adj_p = _pad2(adj, n_dst_p, n_src_p)                       # zero-padded rows/cols
    h_src_p = _pad2(h_src, n_src_p, dp_in)
    h_dst_p = _pad2(h_dst, n_dst_p, dp_in)
    w_cat = jnp.concatenate(
        [_pad2(w_self.astype(jnp.float32), dp_in, dp_out),
         _pad2(w_neigh.astype(jnp.float32), dp_in, dp_out)], axis=0)
    b_p = _pad2(bias.reshape(1, d_out).astype(jnp.float32), 1, dp_out)

    grid = (n_dst_p // tm, n_src_p // tk)
    kernel = functools.partial(_sage_layer_kernel, apply_relu=apply_relu)

    out_p = pl.pallas_call(
        kernel,
        out_shape=jax.ShapeDtypeStruct((n_dst_p, dp_out), jnp.float32),
        grid=grid,
        in_specs=[
            pl.BlockSpec((tm, tk), lambda i, k: (i, k)),          # adjacency tile
            pl.BlockSpec((tk, dp_in), lambda i, k: (k, 0)),       # h_src tile
            pl.BlockSpec((tm, dp_in), lambda i, k: (i, 0)),       # h_dst tile
            pl.BlockSpec((2 * dp_in, dp_out), lambda i, k: (0, 0)),  # [W_self; W_neigh]
            pl.BlockSpec((1, dp_out), lambda i, k: (0, 0)),       # bias
        ],
        out_specs=pl.BlockSpec((tm, dp_out), lambda i, k: (i, 0)),
        scratch_shapes=[pltpu.VMEM((tm, dp_in), jnp.float32)],    # neighbor accumulator
        compiler_params=pltpu.CompilerParams(
            dimension_semantics=("parallel", "arbitrary"),
            vmem_limit_bytes=VMEM_LIMIT),
    )(adj_p, h_src_p, h_dst_p, w_cat, b_p)
    return out_p[:n_dst, :d_out]


# ---------------------------------------------------------------------------
# Decoder kernel: fused edge gather (one-hot MXU gather) + per-edge dot product
# output is lane-dense (1, E_pad); reshaped to (E, 1) in the wrapper.
# ---------------------------------------------------------------------------
def _edge_dot_kernel(src_ref, dst_ref, ht_ref, o_ref):
    n_nodes_p = ht_ref.shape[1]
    te = src_ref.shape[1]
    node_iota = lax.broadcasted_iota(jnp.int32, (n_nodes_p, te), 0)
    p_src = (node_iota == src_ref[...]).astype(jnp.float32)      # (Np, te) one-hot
    p_dst = (node_iota == dst_ref[...]).astype(jnp.float32)
    ht = ht_ref[...]                                             # (dp, Np)
    u_t = jnp.dot(ht, p_src, preferred_element_type=jnp.float32)  # (dp, te) = gathered h[src].T
    v_t = jnp.dot(ht, p_dst, preferred_element_type=jnp.float32)
    o_ref[...] = jnp.sum(u_t * v_t, axis=0, keepdims=True)       # (1, te) lane-dense


def edge_dot(h, src_idx, dst_idx):
    n_nodes, d = h.shape
    e = src_idx.shape[0]
    dp = _round_up(d, LANE)
    n_nodes_p = _round_up(n_nodes, LANE)
    te = min(TE_MAX, _round_up(e, LANE))
    e_p = _round_up(e, te)

    ht = _pad2(h.astype(jnp.float32), n_nodes_p, dp).T           # (dp, Np), zero-padded
    src_p = jnp.pad(src_idx.astype(jnp.int32), (0, e_p - e)).reshape(1, e_p)
    dst_p = jnp.pad(dst_idx.astype(jnp.int32), (0, e_p - e)).reshape(1, e_p)

    out = pl.pallas_call(
        _edge_dot_kernel,
        out_shape=jax.ShapeDtypeStruct((1, e_p), jnp.float32),
        grid=(e_p // te,),
        in_specs=[
            pl.BlockSpec((1, te), lambda ei: (0, ei)),
            pl.BlockSpec((1, te), lambda ei: (0, ei)),
            pl.BlockSpec((dp, n_nodes_p), lambda ei: (0, 0)),
        ],
        out_specs=pl.BlockSpec((1, te), lambda ei: (0, ei)),
        compiler_params=pltpu.CompilerParams(
            dimension_semantics=("parallel",),
            vmem_limit_bytes=VMEM_LIMIT),
    )(src_p, dst_p, ht)
    return out[0, :e].reshape(e, 1)


# ---------------------------------------------------------------------------
# Full model forward
# ---------------------------------------------------------------------------
def sage_link_prediction(adjs, params, decode_src, decode_dst, input_feature):
    """adjs: list of row-normalized (n_dst_i, n_src_i) adjacency matrices (the blocks).
    params: list of (W_self, W_neigh, bias) per hop.
    decode_src/decode_dst: (E,) int32 endpoints into the final dst node set."""
    h = input_feature
    n_hops = len(adjs)
    for i, (a, (w_s, w_n, b)) in enumerate(zip(adjs, params)):
        n_dst = a.shape[0]
        a_b = a.astype(jnp.bfloat16)                   # halve adjacency HBM bytes
        h_in = h.astype(jnp.bfloat16) if i == 0 else h  # fp32 intermediates between hops
        h = sage_layer(a_b, h_in, h_in[:n_dst], w_s, w_n, b,
                       apply_relu=(i < n_hops - 1))
    return edge_dot(h, decode_src, decode_dst)


# ---------------------------------------------------------------------------
# Pure-JAX reference (matches the kernel's bf16 quantization of A / hop-0 features)
# ---------------------------------------------------------------------------
def ref_forward(adjs, params, decode_src, decode_dst, x):
    h = x
    n_hops = len(adjs)
    for i, (a, (w_s, w_n, b)) in enumerate(zip(adjs, params)):
        a32 = a.astype(jnp.bfloat16).astype(jnp.float32)
        h_in = h.astype(jnp.bfloat16).astype(jnp.float32) if i == 0 else h
        h_neigh = a32 @ h_in
        out = h_in[: a.shape[0]] @ w_s + h_neigh @ w_n + b
        if i < n_hops - 1:
            out = jnp.maximum(out, 0.0)
        h = out
    u = h[decode_src]
    v = h[decode_dst]
    return (u * v).sum(axis=-1, keepdims=True)


# ---------------------------------------------------------------------------
def _row_normalized_adj(key, n_dst, n_src):
    # random binary adjacency, mean aggregation = row-normalize (deg clamped >= 1)
    a = (jax.random.uniform(key, (n_dst, n_src)) < 0.3).astype(jnp.float32)
    deg = jnp.clip(a.sum(axis=1, keepdims=True), 1.0, None)
    return a / deg


if __name__ == "__main__":
    # Small, module-consistent shapes:
    #   n_hops = 2, input_dim = 16, hidden_dim = 32, output_dim = 32
    #   block 0: 32 src nodes -> 16 dst nodes ; block 1: 16 src -> 8 dst
    #   decode graph: 8 nodes, 16 edges
    n_hops, input_dim, hidden_dim, output_dim = 2, 16, 32, 32
    n0, n1, n2 = 32, 16, 8
    n_edges = 16

    key = jax.random.PRNGKey(0)
    keys = jax.random.split(key, 12)

    input_feature = jax.random.normal(keys[0], (n0, input_dim), jnp.float32)

    adjs = [
        _row_normalized_adj(keys[1], n1, n0),
        _row_normalized_adj(keys[2], n2, n1),
    ]

    # Deterministic SAGEConv parameters (shapes from SageNet.__init__)
    dims = []
    for i in range(n_hops):
        d_in = input_dim if i == 0 else hidden_dim
        d_out = output_dim if i == n_hops - 1 else hidden_dim
        dims.append((d_in, d_out))
    params = []
    for i, (d_in, d_out) in enumerate(dims):
        w_s = jax.random.normal(keys[3 + 3 * i], (d_in, d_out), jnp.float32) * 0.1
        w_n = jax.random.normal(keys[4 + 3 * i], (d_in, d_out), jnp.float32) * 0.1
        b = jax.random.normal(keys[5 + 3 * i], (d_out,), jnp.float32) * 0.01
        params.append((w_s, w_n, b))

    decode_src = jax.random.randint(keys[10], (n_edges,), 0, n2, jnp.int32)
    decode_dst = jax.random.randint(keys[11], (n_edges,), 0, n2, jnp.int32)

    logits = sage_link_prediction(adjs, params, decode_src, decode_dst,
                                  input_feature)
    logits = jax.block_until_ready(logits)

    expected = ref_forward(adjs, params, decode_src, decode_dst, input_feature)
    assert logits.shape == (n_edges, 1), logits.shape
    # bf16 quantization of A / hop-0 features is matched in the reference; the
    # tolerance only needs to cover fp32 accumulation-order / MXU pass differences.
    assert jnp.allclose(logits, expected, atol=1e-3, rtol=1e-3), (
        jnp.max(jnp.abs(logits - expected)))

    print("KERNEL_OK")
</pallas_src>

<mosaic_0001>
module attributes {stable_mosaic.version = 11 : i64} {
  func.func @_sage_layer_kernel(%arg0: i32, %arg1: i32, %arg2: memref<128x128xbf16, #tpu.memory_space<vmem>>, %arg3: memref<128x128xbf16, #tpu.memory_space<vmem>>, %arg4: memref<128x128xbf16, #tpu.memory_space<vmem>>, %arg5: memref<256x128xf32, #tpu.memory_space<vmem>>, %arg6: memref<1x128xf32, #tpu.memory_space<vmem>>, %arg7: memref<128x128xf32, #tpu.memory_space<vmem>>, %arg8: memref<128x128xf32, #tpu.memory_space<vmem>>) attributes {dimension_semantics = [#tpu.dimension_semantics<parallel>, #tpu.dimension_semantics<arbitrary>], iteration_bounds = array<i64: 1, 1>, scalar_prefetch = 0 : i64, scratch_operands = 1 : i64, tpu.core_type = #tpu.core_type<tc>, window_params = [{transform_indices = @transform_0, window_bounds = array<i64: 128, 128>}, {transform_indices = @transform_1, window_bounds = array<i64: 128, 128>}, {transform_indices = @transform_2, window_bounds = array<i64: 128, 128>}, {pipeline_mode = #tpu.pipeline_mode<synchronous>, transform_indices = @transform_3, window_bounds = array<i64: 256, 128>}, {pipeline_mode = #tpu.pipeline_mode<synchronous>, transform_indices = @transform_4, window_bounds = array<i64: 1, 128>}, {transform_indices = @transform_5, window_bounds = array<i64: 128, 128>}]} {
    %c0_i32 = arith.constant 0 : i32
    %0 = arith.cmpi eq, %arg1, %c0_i32 : i32
    %1 = arith.extui %0 : i1 to i32
    %c0_i32_0 = arith.constant 0 : i32
    %2 = arith.cmpi ne, %1, %c0_i32_0 : i32
    scf.if %2 {
      %cst_10 = arith.constant 0.000000e+00 : f32
      %12 = vector.broadcast %cst_10 : f32 to vector<128x128xf32>
      %c0_11 = arith.constant 0 : index
      %c0_12 = arith.constant 0 : index
      %13 = vector.load %arg8[%c0_11, %c0_12] : memref<128x128xf32, #tpu.memory_space<vmem>>, vector<128x128xf32>
      tpu.vector_store %arg8[%c0_11, %c0_12], %12 {strides = array<i32>} : memref<128x128xf32, #tpu.memory_space<vmem>>, vector<128x128xf32>,
    } else {
    }
    %c0 = arith.constant 0 : index
    %c0_1 = arith.constant 0 : index
    %3 = vector.load %arg8[%c0, %c0_1] : memref<128x128xf32, #tpu.memory_space<vmem>>, vector<128x128xf32>
    %c0_2 = arith.constant 0 : index
    %c0_3 = arith.constant 0 : index
    %4 = vector.load %arg2[%c0_2, %c0_3] : memref<128x128xbf16, #tpu.memory_space<vmem>>, vector<128x128xbf16>
    %c0_4 = arith.constant 0 : index
    %c0_5 = arith.constant 0 : index
    %5 = vector.load %arg3[%c0_4, %c0_5] : memref<128x128xbf16, #tpu.memory_space<vmem>>, vector<128x128xbf16>
    %cst = arith.constant dense<0.000000e+00> : vector<128x128xf32>
    %6 = tpu.matmul %4, %5, %cst {dimension_numbers = #tpu.dot_dimension_numbers<[1], [0], [0], [1], [0, 0, 1, 1], [], []>} : vector<128x128xbf16>, vector<128x128xbf16>, vector<128x128xf32> -> vector<128x128xf32>
    %7 = arith.addf %3, %6 : vector<128x128xf32>
    %c0_6 = arith.constant 0 : index
    %c0_7 = arith.constant 0 : index
    %8 = vector.load %arg8[%c0_6, %c0_7] : memref<128x128xf32, #tpu.memory_space<vmem>>, vector<128x128xf32>
    tpu.vector_store %arg8[%c0_6, %c0_7], %7 {strides = array<i32>} : memref<128x128xf32, #tpu.memory_space<vmem>>, vector<128x128xf32>,
    %c0_i32_8 = arith.constant 0 : i32
    %9 = arith.cmpi eq, %arg1, %c0_i32_8 : i32
    %10 = arith.extui %9 : i1 to i32
    %c0_i32_9 = arith.constant 0 : i32
    %11 = arith.cmpi ne, %10, %c0_i32_9 : i32
    scf.if %11 {
      %c0_10 = arith.constant 0 : index
      %c0_11 = arith.constant 0 : index
      %12 = vector.load %arg4[%c0_10, %c0_11] : memref<128x128xbf16, #tpu.memory_space<vmem>>, vector<128x128xbf16>
      %13 = arith.extf %12 : vector<128x128xbf16> to vector<128x128xf32>
      %c0_12 = arith.constant 0 : index
      %c0_13 = arith.constant 0 : index
      %14 = vector.load %arg8[%c0_12, %c0_13] : memref<128x128xf32, #tpu.memory_space<vmem>>, vector<128x128xf32>
      %15 = tpu.concatenate %13, %14 in 1 : vector<128x128xf32>, vector<128x128xf32> -> vector<128x256xf32>
      %c0_14 = arith.constant 0 : index
      %c0_15 = arith.constant 0 : index
      %16 = vector.load %arg5[%c0_14, %c0_15] : memref<256x128xf32, #tpu.memory_space<vmem>>, vector<256x128xf32>
      %cst_16 = arith.constant dense<0.000000e+00> : vector<128x128xf32>
      %17 = tpu.matmul %15, %16, %cst_16 {dimension_numbers = #tpu.dot_dimension_numbers<[1], [0], [0], [1], [0, 0, 1, 1], [], []>} : vector<128x256xf32>, vector<256x128xf32>, vector<128x128xf32> -> vector<128x128xf32>
      %c0_17 = arith.constant 0 : index
      %c0_18 = arith.constant 0 : index
      %18 = vector.load %arg6[%c0_17, %c0_18] : memref<1x128xf32, #tpu.memory_space<vmem>>, vector<1x128xf32>
      %19 = vector.broadcast %18 : vector<1x128xf32> to vector<128x128xf32>
      %20 = arith.addf %17, %19 : vector<128x128xf32>
      %cst_19 = arith.constant 0.000000e+00 : f32
      %21 = vector.broadcast %cst_19 : f32 to vector<128x128xf32>
      %22 = arith.maximumf %20, %21 : vector<128x128xf32>
      %c0_20 = arith.constant 0 : index
      %c0_21 = arith.constant 0 : index
      %23 = vector.load %arg7[%c0_20, %c0_21] : memref<128x128xf32, #tpu.memory_space<vmem>>, vector<128x128xf32>
      tpu.vector_store %arg7[%c0_20, %c0_21], %22 {strides = array<i32>} : memref<128x128xf32, #tpu.memory_space<vmem>>, vector<128x128xf32>,
    } else {
    }
    return
  }
  func.func @transform_0(%arg0: i32, %arg1: i32) -> (i32, i32) {
    %c0_i32 = arith.constant 0 : i32
    return %arg0, %arg1 : i32, i32
  }
  func.func @transform_1(%arg0: i32, %arg1: i32) -> (i32, i32) {
    %c0_i32 = arith.constant 0 : i32
    %c0_i32_0 = arith.constant 0 : i32
    return %arg1, %c0_i32 : i32, i32
  }
  func.func @transform_2(%arg0: i32, %arg1: i32) -> (i32, i32) {
    %c0_i32 = arith.constant 0 : i32
    %c0_i32_0 = arith.constant 0 : i32
    return %arg0, %c0_i32 : i32, i32
  }
  func.func @transform_3(%arg0: i32, %arg1: i32) -> (i32, i32) {
    %c0_i32 = arith.constant 0 : i32
    %c0_i32_0 = arith.constant 0 : i32
    %c0_i32_1 = arith.constant 0 : i32
    return %c0_i32, %c0_i32_0 : i32, i32
  }
  func.func @transform_4(%arg0: i32, %arg1: i32) -> (i32, i32) {
    %c0_i32 = arith.constant 0 : i32
    %c0_i32_0 = arith.constant 0 : i32
    %c0_i32_1 = arith.constant 0 : i32
    return %c0_i32, %c0_i32_0 : i32, i32
  }
  func.func @transform_5(%arg0: i32, %arg1: i32) -> (i32, i32) {
    %c0_i32 = arith.constant 0 : i32
    %c0_i32_0 = arith.constant 0 : i32
    return %arg0, %c0_i32 : i32, i32
  }
}

</mosaic_0001>

<bundles_post_ra>
// kernel: tpu_custom_call.1
= control target key start
LH: loop header
LB: loop body
LE: loop exit
PB: predicated region body
PF: predicated region fallthrough
CT: control target
= control target key end

     0   :  { %10 = vsyncpa [#allocation4], 0  ;;  %s1017_s0 = inlined_call_operand.hbm [shape: bf16[128,128], index: 0, kind: input, shape index: {}]   ;;  %s1018_s1 = inlined_call_operand.hbm [shape: bf16[128,128], index: 1, kind: input, shape index: {}]   ;;  %s1019_s2 = inlined_call_operand.hbm [shape: bf16[128,128], index: 2, kind: input, shape index: {}]   ;;  %s1020_s3 = inlined_call_operand.hbm [shape: f32[256,128], index: 3, kind: input, shape index: {}]   ;;  %s1021_s4 = inlined_call_operand.vmem [shape: f32[1,128], index: 4, kind: input, shape index: {}]   ;;  %s1022_s5 = inlined_call_operand.hbm [shape: f32[128,128], index: 5, kind: output, shape index: {}]  }
   0x1   :  { %11 = vsyncpa [#allocation7], 0 }
   0x2   :  { %12 = vsyncpa [#allocation10], 0 }
   0x3   :  { %13 = vsyncpa [#allocation5], 0  ;;  %s31_s20 = sshll.u32 %s1018_s1, 4  ;;  %s896_s21 = smov [#allocation6]   ;;  %s32_s20 = int_to_ptr.hbm [resolvable:$true] %s31_s20 }
   0x4   :  { %s33_s22 = sshll.u32 %s896_s21, 4  ;;  %s18_s25 = sshll.u32 %s1017_s0, 4  ;;  %s34_s22 = int_to_ptr.vmem [resolvable:$true] %s33_s22  ;;  %s19_s25 = int_to_ptr.hbm [resolvable:$true] %s18_s25 }
   0x5   :  { %s897_s26 = smov 64   ;;  %s898_s27 = smov 4  }
   0x6   :  { %39 = dma.hbm_to_vmem [thread:$0]  %s32_s20, 1024, %s34_s22, [#allocation7], %s897_s26, %s897_s26, %s898_s27  }
   0x7   :  { %s899_s28 = smov [#allocation3]   ;;  %s44_s7 = sshll.u32 %s1019_s2, 4  ;;  %s45_s7 = int_to_ptr.hbm [resolvable:$true] %s44_s7 }
   0x8   :  { %s20_s29 = sshll.u32 %s899_s28, 4  ;;  %s57_s9 = sshll.u32 %s1020_s3, 4  ;;  %s21_s29 = int_to_ptr.vmem [resolvable:$true] %s20_s29  ;;  %s58_s9 = int_to_ptr.hbm [resolvable:$true] %s57_s9 }
   0x9   :  { %26 = dma.hbm_to_vmem [thread:$0]  %s19_s25, 1024, %s21_s29, [#allocation4], %s897_s26, %s897_s26, %s898_s27  }
   0xa   :  { %s900_s10 = smov [#allocation8]   ;;  %s901_s0 = smov [#allocation9]  }
   0xb   :  { %s46_s11 = sshll.u32 %s900_s10, 4  ;;  %s59_s12 = sshll.u32 %s901_s0, 4  ;;  %s47_s11 = int_to_ptr.vmem [resolvable:$true] %s46_s11  ;;  %s60_s12 = int_to_ptr.vmem [resolvable:$true] %s59_s12 }
   0xc   :  { %52 = dma.hbm_to_vmem [thread:$0]  %s45_s7, 1024, %s47_s11, [#allocation7], %s897_s26, %s897_s26, %s898_s27  }
   0xd   :  { %s902_s13 = smov 128   ;;  %s903_s14 = smov 8  }
   0xe   :  { %65 = dma.hbm_to_vmem [thread:$0]  %s58_s9, 4096, %s60_s12, [#allocation10], %s902_s13, %s902_s13, %s903_s14  }
   0xf   :  { %888 = dma.done.wait [#allocation4], 1024  }
  0x10   :  { %889 = vsyncadd [#allocation4], 4294966272 }
  0x11   :  { %890 = dma.done.wait [#allocation7], 2048  }
  0x12   :  { %891 = vsyncadd [#allocation7], 4294965248 }
  0x13   :  { %892 = dma.done.wait [#allocation10], 4096  }
  0x14   :  { %893 = vsyncadd [#allocation10], 4294963200  ;;  %v678_v0 = vld [vmem:[#allocation6 + $0x38] sm:$0xff]  ;;  %v677_v1 = vld [vmem:[#allocation6 + $0x30] sm:$0xff]  ;;  %s584_s18 = sshll.u32 %s1022_s5, 4  ;;  %s585_s18 = int_to_ptr.hbm [resolvable:$true] %s584_s18 }
  0x15   :  { %248 = vmatpush.bf16.msra.mxu0 %v678_v0  ;;  %718 = vmatpush.bf16.msra.mxu3 %v678_v0  ;;  %v676_v2 = vld [vmem:[#allocation6 + $0x28] sm:$0xff]  ;;  %v675_v3 = vld [vmem:[#allocation6 + $0x20] sm:$0xff]  ;;  %v674_v4 = vld [vmem:[#allocation6 + $0x18] sm:$0xff] }
  0x16   :  { %v673_v5 = vld [vmem:[#allocation6 + $0x10] sm:$0xff]  ;;  %v672_v6 = vld [vmem:[#allocation6 + $0x8] sm:$0xff]  ;;  %v671_v7 = vld [vmem:[#allocation6] sm:$0xff] }
  0x17   :  { %v663_v8 = vld [vmem:[#allocation3] sm:$0xff]  ;;  %v669_v9 = vld [vmem:[#allocation3 + $0x30] sm:$0xff]  ;;  %v664_v10 = vld [vmem:[#allocation3 + $0x8] sm:$0xff] }
  0x18   :  { %v670_v11 = vld [vmem:[#allocation3 + $0x38] sm:$0xff]  ;;  %v665_v12 = vld [vmem:[#allocation3 + $0x10] sm:$0xff]  ;;  %v955_v18 = vld [vmem:[#allocation9 + $0xe8] sm:$0xff] }
  0x19   :  { %249 = vmatpush.bf16.msra.mxu0 %v677_v1  ;;  %719 = vmatpush.bf16.msra.mxu3 %v677_v1  ;;  %v666_v13 = vld [vmem:[#allocation3 + $0x18] sm:$0xff]  ;;  %v952_v16 = vld [vmem:[#allocation9 + $0xf0] sm:$0xff]  ;;  %v393_v19 = vld [vmem:[#allocation9 + $0x68] sm:$0xff] }
  0x1a   :  { %v950_v14 = vld [vmem:[#allocation9 + $0xf8] sm:$0xff]  ;;  %v394_v17 = vld [vmem:[#allocation9 + $0x70] sm:$0xff]  ;;  %v958_v20 = vld [vmem:[#allocation9 + $0xe0] sm:$0xff] }
  0x1b   :  { %v395_v15 = vld [vmem:[#allocation9 + $0x78] sm:$0xff]  ;;  %481 = vmatpush.msra.mxu2 %v950_v14  ;;  %v392_v21 = vld [vmem:[#allocation9 + $0x60] sm:$0xff]  ;;  %v964_v24 = vld [vmem:[#allocation9 + $0xd0] sm:$0xff] }
  0x1c   :  { %416 = vmatpush.msra.mxu1 %v395_v15  ;;  %v961_v22 = vld [vmem:[#allocation9 + $0xd8] sm:$0xff]  ;;  %v390_v25 = vld [vmem:[#allocation9 + $0x50] sm:$0xff]  ;;  %v967_v26 = vld [vmem:[#allocation9 + $0xc8] sm:$0xff] }
  0x1d   :  { %250 = vmatpush.bf16.msra.mxu0 %v676_v2  ;;  %720 = vmatpush.bf16.msra.mxu3 %v676_v2  ;;  %v391_v23 = vld [vmem:[#allocation9 + $0x58] sm:$0xff]  ;;  %v389_v27 = vld [vmem:[#allocation9 + $0x48] sm:$0xff]  ;;  %v667_v28 = vld [vmem:[#allocation3 + $0x20] sm:$0xff] }
  0x1e   :  { %482 = vmatpush.msra.mxu2 %v952_v16  ;;  %417 = vmatpush.msra.mxu1 %v394_v17  ;;  %v970_v29 = vld [vmem:[#allocation9 + $0xc0] sm:$0xff]  ;;  %v973_v31 = vld [vmem:[#allocation9 + $0xb8] sm:$0xff]  ;;  %v976_v33 = vld [vmem:[#allocation9 + $0xb0] sm:$0xff] }
  0x1f   :  { %v388_v30 = vld [vmem:[#allocation9 + $0x40] sm:$0xff]  ;;  %v387_v32 = vld [vmem:[#allocation9 + $0x38] sm:$0xff]  ;;  %v386_v34 = vld [vmem:[#allocation9 + $0x30] sm:$0xff] }
  0x20   :  { %483 = vmatpush.msra.mxu2 %v955_v18  ;;  %418 = vmatpush.msra.mxu1 %v393_v19  ;;  %v401_v35 = vld [vmem:[#allocation9 + $0xa8] sm:$0xff]  ;;  %v400_v37 = vld [vmem:[#allocation9 + $0xa0] sm:$0xff]  ;;  %v399_v39 = vld [vmem:[#allocation9 + $0x98] sm:$0xff] }
  0x21   :  { %251 = vmatpush.bf16.msra.mxu0 %v675_v3  ;;  %721 = vmatpush.bf16.msra.mxu3 %v675_v3  ;;  %v385_v36 = vld [vmem:[#allocation9 + $0x28] sm:$0xff]  ;;  %v384_v38 = vld [vmem:[#allocation9 + $0x20] sm:$0xff]  ;;  %v383_v40 = vld [vmem:[#allocation9 + $0x18] sm:$0xff] }
  0x22   :  { %484 = vmatpush.msra.mxu2 %v958_v20  ;;  %419 = vmatpush.msra.mxu1 %v392_v21  ;;  %v398_v41 = vld [vmem:[#allocation9 + $0x90] sm:$0xff]  ;;  %v397_v43 = vld [vmem:[#allocation9 + $0x88] sm:$0xff]  ;;  %v396_v46 = vld [vmem:[#allocation9 + $0x80] sm:$0xff] }
  0x23   :  { %v382_v42 = vld [vmem:[#allocation9 + $0x10] sm:$0xff]  ;;  %v668_v44 = vld [vmem:[#allocation3 + $0x28] sm:$0xff]  ;;  %v380_v48 = vld [vmem:[#allocation9] sm:$0xff] }
  0x24   :  { %485 = vmatpush.msra.mxu2 %v961_v22  ;;  %420 = vmatpush.msra.mxu1 %v391_v23  ;;  %v381_v45 = vld [vmem:[#allocation9 + $0x8] sm:$0xff]  ;;  %v716_v47 = vld [vmem:[#allocation8 + $0x30] sm:$0xff]   ;;  %v680_v50 = vld [vmem:[#allocation8] sm:$0xff]  }
  0x25   :  { %252 = vmatpush.bf16.msra.mxu0 %v674_v4  ;;  %722 = vmatpush.bf16.msra.mxu3 %v674_v4  ;;  %v705_v49 = vunpack.c.l.bf16 %v716_v47  ;;  %v681_v51 = vunpack.c.l.bf16 %v680_v50  ;;  %v706_v52 = vunpack.c.h.bf16 %v716_v47  ;;  %v682_v53 = vunpack.c.h.bf16 %v680_v50  ;;  %v717_v54 = vld [vmem:[#allocation8 + $0x38] sm:$0xff]   ;;  %v711_v56 = vld [vmem:[#allocation8 + $0x8] sm:$0xff]   ;;  %v712_v61 = vld [vmem:[#allocation8 + $0x10] sm:$0xff]  }
  0x26   :  { %486 = vmatpush.msra.mxu2 %v964_v24  ;;  %421 = vmatpush.msra.mxu1 %v390_v25  ;;  %v709_v55 = vunpack.c.l.bf16 %v717_v54  ;;  %v685_v57 = vunpack.c.l.bf16 %v711_v56  ;;  %v710_v58 = vunpack.c.h.bf16 %v717_v54  ;;  %v686_v59 = vunpack.c.h.bf16 %v711_v56  ;;  %v713_v4 = vld [vmem:[#allocation8 + $0x18] sm:$0xff]  }
  0x27   :  { %v689_v62 = vunpack.c.l.bf16 %v712_v61  ;;  %v690_v1 = vunpack.c.h.bf16 %v712_v61 }
  0x28   :  { %487 = vmatpush.msra.mxu2 %v967_v26  ;;  %422 = vmatpush.msra.mxu1 %v389_v27 }
  0x29   :  { %253 = vmatpush.bf16.msra.mxu0 %v673_v5  ;;  %723 = vmatpush.bf16.msra.mxu3 %v673_v5  ;;  %v693_v5 = vunpack.c.l.bf16 %v713_v4 }
  0x2a   :  { %488 = vmatpush.msra.mxu2 %v970_v29  ;;  %423 = vmatpush.msra.mxu1 %v388_v30 }
  0x2c   :  { %489 = vmatpush.msra.mxu2 %v973_v31  ;;  %424 = vmatpush.msra.mxu1 %v387_v32 }
  0x2d   :  { %254 = vmatpush.bf16.msra.mxu0 %v672_v6  ;;  %724 = vmatpush.bf16.msra.mxu3 %v672_v6 }
  0x2e   :  { %490 = vmatpush.msra.mxu2 %v976_v33  ;;  %425 = vmatpush.msra.mxu1 %v386_v34 }
  0x30   :  { %491 = vmatpush.msra.mxu2 %v401_v35  ;;  %426 = vmatpush.msra.mxu1 %v385_v36 }
  0x31   :  { %255 = vmatpush.bf16.msra.mxu0 %v671_v7  ;;  %725 = vmatpush.bf16.msra.mxu3 %v671_v7 }
  0x32   :  { %492 = vmatpush.msra.mxu2 %v400_v37  ;;  %427 = vmatpush.msra.mxu1 %v384_v38 }
  0x34   :  { %256 = vmatmul.bf16.vlgmr.msra.gmra.mxu0 %v663_v8  ;;  %286 = vmatmul.bf16.vlgmr.msra.gmra.mxu3 %v669_v9  ;;  %v694_v8 = vunpack.c.h.bf16 %v713_v4 }
  0x35   :  { %726 = vmatpush.msrb.mxu3 %v395_v15  ;;  %493 = vmatpush.msra.mxu2 %v399_v39 }
  0x36   :  { %428 = vmatpush.msra.mxu1 %v383_v40 }
  0x37   :  { %727 = vmatpush.msrb.mxu3 %v394_v17  ;;  %494 = vmatpush.msra.mxu2 %v398_v41 }
  0x38   :  { %429 = vmatpush.msra.mxu1 %v382_v42 }
  0x39   :  { %728 = vmatpush.msrb.mxu3 %v393_v19  ;;  %495 = vmatpush.msra.mxu2 %v397_v43 }
  0x3a   :  { %430 = vmatpush.msra.mxu1 %v381_v45 }
  0x3b   :  { %729 = vmatpush.msrb.mxu3 %v392_v21  ;;  %496 = vmatpush.msra.mxu2 %v396_v46 }
  0x3c   :  { %431 = vmatpush.msra.mxu1 %v380_v48 }
  0x3d   :  { %730 = vmatpush.msrb.mxu3 %v391_v23  ;;  %432 = vmatmul.f32.vlgmr.msra.gmra.mxu1 %v681_v51 }
  0x3f   :  { %731 = vmatpush.msrb.mxu3 %v390_v25 }
  0x41   :  { %732 = vmatpush.msrb.mxu3 %v389_v27 }
  0x43   :  { %733 = vmatpush.msrb.mxu3 %v388_v30  ;;  %v993_v30 = vld [vmem:[%s1021_s4] ss:$0 sm:$0xff]  ;;  %s904_s4 = smov [#allocation11]  }
  0x44   :  { %261 = vmatmul.bf16.gmra.mxu0 %v664_v10  ;;  %291 = vmatmul.bf16.gmra.mxu3 %v670_v11  ;;  %v714_v11 = vld [vmem:[#allocation8 + $0x20] sm:$0xff]   ;;  %s582_s15 = sshll.u32 %s904_s4, 4  ;;  %s583_s15 = int_to_ptr.vmem [resolvable:$true] %s582_s15 }
  0x45   :  { %734 = vmatpush.msrb.mxu3 %v387_v32  ;;  %435 = vmatmul.f32.gmra.mxu1 %v682_v53 }
  0x47   :  { %735 = vmatpush.msrb.mxu3 %v386_v34 }
  0x49   :  { %736 = vmatpush.msrb.mxu3 %v385_v36 }
  0x4b   :  { %737 = vmatpush.msrb.mxu3 %v384_v38 }
  0x4d   :  { %738 = vmatpush.msrb.mxu3 %v383_v40  ;;  %438 = vmatmul.f32.gmra.mxu1 %v685_v57 }
  0x4f   :  { %739 = vmatpush.msrb.mxu3 %v382_v42 }
  0x51   :  { %740 = vmatpush.msrb.mxu3 %v381_v45 }
  0x53   :  { %741 = vmatpush.msrb.mxu3 %v380_v48 }
  0x54   :  { %266 = vmatmul.bf16.gmra.mxu0 %v665_v12  ;;  %468 = vmatmul.f32.vlgmr.msrb.gmra.mxu3 %v705_v49  ;;  %v697_v12 = vunpack.c.l.bf16 %v714_v11 }
  0x55   :  { %742 = vmatpush.msra.mxu3 %v950_v14  ;;  %441 = vmatmul.f32.gmra.mxu1 %v686_v59  ;;  %v698_v14 = vunpack.c.h.bf16 %v714_v11 }
  0x57   :  { %743 = vmatpush.msra.mxu3 %v952_v16  ;;  %v715_v16 = vld [vmem:[#allocation8 + $0x28] sm:$0xff]  }
  0x58   :  { %v701_v17 = vunpack.c.l.bf16 %v715_v16  ;;  %v702_v19 = vunpack.c.h.bf16 %v715_v16 }
  0x59   :  { %744 = vmatpush.msra.mxu3 %v955_v18 }
  0x5b   :  { %745 = vmatpush.msra.mxu3 %v958_v20 }
  0x5c   :  { %471 = vmatmul.f32.gmra.mxu3 %v706_v52 }
  0x5d   :  { %746 = vmatpush.msra.mxu3 %v961_v22  ;;  %444 = vmatmul.f32.gmra.mxu1 %v689_v62 }
  0x5f   :  { %747 = vmatpush.msra.mxu3 %v964_v24 }
  0x61   :  { %748 = vmatpush.msra.mxu3 %v967_v26 }
  0x63   :  { %749 = vmatpush.msra.mxu3 %v970_v29 }
  0x64   :  { %271 = vmatmul.bf16.gmra.mxu0 %v666_v13  ;;  %474 = vmatmul.f32.gmra.mxu3 %v709_v55 }
  0x65   :  { %750 = vmatpush.msra.mxu3 %v973_v31  ;;  %447 = vmatmul.f32.gmra.mxu1 %v690_v1 }
  0x67   :  { %751 = vmatpush.msra.mxu3 %v976_v33 }
  0x69   :  { %752 = vmatpush.msra.mxu3 %v401_v35 }
  0x6b   :  { %753 = vmatpush.msra.mxu3 %v400_v37 }
  0x6c   :  { %477 = vmatmul.f32.gmra.mxu3 %v710_v58 }
  0x6d   :  { %754 = vmatpush.msra.mxu3 %v399_v39  ;;  %450 = vmatmul.f32.gmra.mxu1 %v693_v5 }
  0x6f   :  { %755 = vmatpush.msra.mxu3 %v398_v41 }
  0x71   :  { %756 = vmatpush.msra.mxu3 %v397_v43 }
  0x73   :  { %757 = vmatpush.msra.mxu3 %v396_v46 }
  0x74   :  { %276 = vmatmul.bf16.gmra.mxu0 %v667_v28 }
  0x75   :  { %453 = vmatmul.f32.gmra.mxu1 %v694_v8 }
  0x7d   :  { %456 = vmatmul.f32.gmra.mxu1 %v697_v12 }
  0x84   :  { %281 = vmatmul.bf16.gmra.mxu0 %v668_v44 }
  0x85   :  { %459 = vmatmul.f32.gmra.mxu1 %v698_v14 }
  0x8d   :  { %462 = vmatmul.f32.gmra.mxu1 %v701_v17 }
  0x95   :  { %465 = vmatmul.f32.gmra.mxu1 %v702_v19 }
  0xb1   :  { %v257_v60 = vpop.f32.mrf.mxu0 }
  0xb2   :  { %497 = vmatmul.f32.vlgmr.msra.gmra.mxu2 %v257_v60 }
  0xb7   :  { %v287_v63 = vpop.f32.mrf.mxu3 }
  0xb8   :  { %533 = vmatmul.f32.vlgmr.msra.gmra.mxu3 %v287_v63 }
  0xb9   :  { %v259_v0 = vpop.f32.mrf.mxu0 }
  0xba   :  { %500 = vmatmul.f32.gmra.mxu2 %v259_v0  ;;  %v433_v25 = vpop.f32.mrf.mxu1 }
  0xbb   :  { %v434_v32 = vadd.f32 %v993_v30, %v433_v25 }
  0xbf   :  { %v289_v2 = vpop.f32.mrf.mxu3 }
  0xc0   :  { %536 = vmatmul.f32.gmra.mxu3 %v289_v2 }
  0xc1   :  { %v262_v3 = vpop.f32.mrf.mxu0 }
  0xc2   :  { %503 = vmatmul.f32.gmra.mxu2 %v262_v3  ;;  %v436_v27 = vpop.f32.mrf.mxu1 }
  0xc3   :  { %v437_v38 = vadd.f32 %v993_v30, %v436_v27 }
  0xc7   :  { %v292_v6 = vpop.f32.mrf.mxu3 }
  0xc8   :  { %539 = vmatmul.f32.gmra.mxu3 %v292_v6 }
  0xc9   :  { %v264_v7 = vpop.f32.mrf.mxu0 }
  0xca   :  { %506 = vmatmul.f32.gmra.mxu2 %v264_v7  ;;  %v439_v29 = vpop.f32.mrf.mxu1 }
  0xcb   :  { %v440_v47 = vadd.f32 %v993_v30, %v439_v29 }
  0xcf   :  { %v294_v9 = vpop.f32.mrf.mxu3 }
  0xd0   :  { %542 = vmatmul.f32.gmra.mxu3 %v294_v9 }
  0xd1   :  { %v267_v10 = vpop.f32.mrf.mxu0 }
  0xd2   :  { %509 = vmatmul.f32.gmra.mxu2 %v267_v10  ;;  %v442_v35 = vpop.f32.mrf.mxu1 }
  0xd3   :  { %v443_v55 = vadd.f32 %v993_v30, %v442_v35 }
  0xd7   :  { %v469_v24 = vpop.f32.mrf.mxu3 }
  0xd8   :  { %v470_v37 = vadd.f32 %v993_v30, %v469_v24 }
  0xd9   :  { %v269_v13 = vpop.f32.mrf.mxu0 }
  0xda   :  { %512 = vmatmul.f32.gmra.mxu2 %v269_v13  ;;  %v445_v46 = vpop.f32.mrf.mxu1 }
  0xdb   :  { %v446_v0 = vadd.f32 %v993_v30, %v445_v46 }
  0xdf   :  { %v472_v26 = vpop.f32.mrf.mxu3 }
  0xe0   :  { %v473_v45 = vadd.f32 %v993_v30, %v472_v26 }
  0xe1   :  { %v272_v15 = vpop.f32.mrf.mxu0 }
  0xe2   :  { %515 = vmatmul.f32.gmra.mxu2 %v272_v15  ;;  %v448_v56 = vpop.f32.mrf.mxu1 }
  0xe3   :  { %v449_v8 = vadd.f32 %v993_v30, %v448_v56 }
  0xe7   :  { %v475_v28 = vpop.f32.mrf.mxu3 }
  0xe8   :  { %v476_v54 = vadd.f32 %v993_v30, %v475_v28 }
  0xe9   :  { %v274_v18 = vpop.f32.mrf.mxu0 }
  0xea   :  { %518 = vmatmul.f32.gmra.mxu2 %v274_v18  ;;  %v451_v4 = vpop.f32.mrf.mxu1 }
  0xeb   :  { %v452_v13 = vadd.f32 %v993_v30, %v451_v4 }
  0xef   :  { %v478_v31 = vpop.f32.mrf.mxu3 }
  0xf0   :  { %v479_v63 = vadd.f32 %v993_v30, %v478_v31 }
  0xf1   :  { %v277_v20 = vpop.f32.mrf.mxu0 }
  0xf2   :  { %521 = vmatmul.f32.gmra.mxu2 %v277_v20  ;;  %v454_v11 = vpop.f32.mrf.mxu1 }
  0xf3   :  { %v455_v18 = vadd.f32 %v993_v30, %v454_v11 }
  0xf9   :  { %v279_v21 = vpop.f32.mrf.mxu0 }
  0xfa   :  { %524 = vmatmul.f32.gmra.mxu2 %v279_v21  ;;  %v457_v17 = vpop.f32.mrf.mxu1 }
 0x101   :  { %v282_v22 = vpop.f32.mrf.mxu0 }
 0x102   :  { %527 = vmatmul.f32.gmra.mxu2 %v282_v22  ;;  %v458_v22 = vadd.f32 %v993_v30, %v457_v17 }
 0x109   :  { %v284_v23 = vpop.f32.mrf.mxu0 }
 0x10a   :  { %530 = vmatmul.f32.gmra.mxu2 %v284_v23  ;;  %v460_v23 = vpop.f32.mrf.mxu1 }
 0x10b   :  { %v461_v27 = vadd.f32 %v993_v30, %v460_v23 }
 0x112   :  { %v463_v29 = vpop.f32.mrf.mxu1 }
 0x135   :  { %v498_v33 = vpop.f32.mrf.mxu2 }
 0x136   :  { %v499_v34 = vadd.f32 %v498_v33, %v434_v32  ;;  %v464_v33 = vadd.f32 %v993_v30, %v463_v29 }
 0x138   :  { %v546_v36 = vmax.f32 %v499_v34, 0.0 }
 0x13a   :  { %562 = vst [vmem:[#allocation11] sm:$0xff] %v546_v36  ;;  %v466_v36 = vpop.f32.mrf.mxu1 }
 0x13b   :  { %v534_v39 = vpop.f32.mrf.mxu3 }
 0x13c   :  { %v535_v40 = vadd.f32 %v534_v39, %v470_v37 }
 0x13d   :  { %v501_v41 = vpop.f32.mrf.mxu2 }
 0x13e   :  { %v502_v42 = vadd.f32 %v501_v41, %v437_v38  ;;  %v558_v43 = vmax.f32 %v535_v40, 0.0  ;;  %v467_v38 = vadd.f32 %v993_v30, %v466_v36 }
 0x140   :  { %v547_v44 = vmax.f32 %v502_v42, 0.0  ;;  %574 = vst [vmem:[#allocation11 + $0x60] sm:$0xff] %v558_v43 }
 0x142   :  { %563 = vst [vmem:[#allocation11 + $0x8] sm:$0xff] %v547_v44 }
 0x143   :  { %v537_v48 = vpop.f32.mrf.mxu3 }
 0x144   :  { %v538_v49 = vadd.f32 %v537_v48, %v473_v45 }
 0x145   :  { %v504_v50 = vpop.f32.mrf.mxu2 }
 0x146   :  { %v505_v51 = vadd.f32 %v504_v50, %v440_v47  ;;  %v559_v52 = vmax.f32 %v538_v49, 0.0 }
 0x148   :  { %v548_v53 = vmax.f32 %v505_v51, 0.0  ;;  %575 = vst [vmem:[#allocation11 + $0x68] sm:$0xff] %v559_v52 }
 0x14a   :  { %564 = vst [vmem:[#allocation11 + $0x10] sm:$0xff] %v548_v53 }
 0x14b   :  { %v540_v57 = vpop.f32.mrf.mxu3 }
 0x14c   :  { %v541_v58 = vadd.f32 %v540_v57, %v476_v54 }
 0x14d   :  { %v507_v59 = vpop.f32.mrf.mxu2 }
 0x14e   :  { %v508_v60 = vadd.f32 %v507_v59, %v443_v55  ;;  %v560_v61 = vmax.f32 %v541_v58, 0.0 }
 0x150   :  { %v549_v62 = vmax.f32 %v508_v60, 0.0  ;;  %576 = vst [vmem:[#allocation11 + $0x70] sm:$0xff] %v560_v61 }
 0x152   :  { %565 = vst [vmem:[#allocation11 + $0x18] sm:$0xff] %v549_v62 }
 0x153   :  { %v543_v1 = vpop.f32.mrf.mxu3 }
 0x154   :  { %v544_v2 = vadd.f32 %v543_v1, %v479_v63 }
 0x155   :  { %v510_v3 = vpop.f32.mrf.mxu2 }
 0x156   :  { %v511_v5 = vadd.f32 %v510_v3, %v446_v0  ;;  %v561_v6 = vmax.f32 %v544_v2, 0.0 }
 0x158   :  { %v550_v7 = vmax.f32 %v511_v5, 0.0  ;;  %577 = vst [vmem:[#allocation11 + $0x78] sm:$0xff] %v561_v6 }
 0x15a   :  { %566 = vst [vmem:[#allocation11 + $0x20] sm:$0xff] %v550_v7 }
 0x15d   :  { %v513_v9 = vpop.f32.mrf.mxu2 }
 0x15e   :  { %v514_v10 = vadd.f32 %v513_v9, %v449_v8 }
 0x160   :  { %v551_v12 = vmax.f32 %v514_v10, 0.0 }
 0x162   :  { %567 = vst [vmem:[#allocation11 + $0x28] sm:$0xff] %v551_v12 }
 0x165   :  { %v516_v14 = vpop.f32.mrf.mxu2 }
 0x166   :  { %v517_v15 = vadd.f32 %v516_v14, %v452_v13 }
 0x168   :  { %v552_v16 = vmax.f32 %v517_v15, 0.0 }
 0x16a   :  { %568 = vst [vmem:[#allocation11 + $0x30] sm:$0xff] %v552_v16 }
 0x16d   :  { %v519_v19 = vpop.f32.mrf.mxu2 }
 0x16e   :  { %v520_v20 = vadd.f32 %v519_v19, %v455_v18 }
 0x170   :  { %v553_v21 = vmax.f32 %v520_v20, 0.0 }
 0x172   :  { %569 = vst [vmem:[#allocation11 + $0x38] sm:$0xff] %v553_v21 }
 0x175   :  { %v522_v24 = vpop.f32.mrf.mxu2 }
 0x176   :  { %v523_v25 = vadd.f32 %v522_v24, %v458_v22 }
 0x178   :  { %v554_v26 = vmax.f32 %v523_v25, 0.0 }
 0x17a   :  { %570 = vst [vmem:[#allocation11 + $0x40] sm:$0xff] %v554_v26 }
 0x17d   :  { %v525_v28 = vpop.f32.mrf.mxu2 }
 0x17e   :  { %v526_v31 = vadd.f32 %v525_v28, %v461_v27 }
 0x180   :  { %v555_v32 = vmax.f32 %v526_v31, 0.0 }
 0x182   :  { %571 = vst [vmem:[#allocation11 + $0x48] sm:$0xff] %v555_v32 }
 0x185   :  { %v528_v34 = vpop.f32.mrf.mxu2 }
 0x186   :  { %v529_v35 = vadd.f32 %v528_v34, %v464_v33 }
 0x188   :  { %v556_v37 = vmax.f32 %v529_v35, 0.0 }
 0x18a   :  { %572 = vst [vmem:[#allocation11 + $0x50] sm:$0xff] %v556_v37 }
 0x18d   :  { %v531_v39 = vpop.f32.mrf.mxu2 }
 0x18e   :  { %v532_v40 = vadd.f32 %v531_v39, %v467_v38 }
 0x190   :  { %v557_v41 = vmax.f32 %v532_v40, 0.0 }
 0x192   :  { %573 = vst [vmem:[#allocation11 + $0x58] sm:$0xff] %v557_v41 }
 0x193   :  { %590 = dma.vmem_to_hbm [thread:$0]  %s583_s15, 2048, %s585_s18, [#allocation5], %s902_s13, %s902_s13, %s903_s14  }
 0x194   :  { %894 = dma.done.wait [#allocation5], 2048  }
 0x195   :  { %895 = vsyncadd [#allocation5], 4294965248 }
 0x196   :  { %595 = vsyncpa [#allocation4], 1 }
 0x197   :  { %596 = vsyncpa [#allocation7], 1 }
 0x198   :  { %597 = vsyncpa [#allocation10], 1 }
 0x199   :  { %598 = vsyncpa [#allocation5], 1 }

</bundles_post_ra>
